<compile_context>
chip_gen: v7x
topology: tpu7x:2x2x1
jax: 0.10.0
libtpu: 0.0.40
codegen_flags: <defaults>
</compile_context>

<pallas_src>
import functools

import jax
import jax.numpy as jnp
from jax.experimental import pallas as pl
from jax.experimental.pallas import tpu as pltpu

EPS = 1e-3  # eps in CPGNetCriterion._get_weight


# ----------------------------- Kernel 1: prep -------------------------------
# layout: logits (C, TP) f32, target (1, TP) i32 (padded points have target = -1).
# outputs: errors (C, TP), fg (C, TP), and resident accumulators counts (C,1), nll_sum (C,1).
def _prep_kernel(logits_ref, target_ref, errors_ref, fg_ref, counts_ref, nll_ref):
    x = logits_ref[...]                              # (C, TP) f32
    t = target_ref[...]                              # (1, TP) i32
    C, TP = x.shape

    cls_iota = jax.lax.broadcasted_iota(jnp.int32, (C, TP), 0)
    onehot = (t == cls_iota).astype(jnp.float32)     # (C, TP); padded cols (t = -1) -> all zero
    valid = t >= 0                                   # (1, TP) bool

    # softmax / log-softmax along classes (sublane axis)
    m = jnp.max(x, axis=0, keepdims=True)            # (1, TP)
    e = jnp.exp(x - m)
    s = jnp.sum(e, axis=0, keepdims=True)
    probs = e / s
    logprobs = (x - m) - jnp.log(s)

    # resident per-class accumulators (same output block every grid step)
    @pl.when(pl.program_id(0) == 0)
    def _():
        counts_ref[...] = jnp.zeros_like(counts_ref)
        nll_ref[...] = jnp.zeros_like(nll_ref)

    counts_ref[...] += jnp.sum(onehot, axis=1, keepdims=True)            # per-class point count
    nll_ref[...] += -jnp.sum(onehot * logprobs, axis=1, keepdims=True)   # per-class NLL sum

    errors_ref[...] = jnp.where(valid, jnp.abs(onehot - probs), 0.0)     # padded cols -> 0
    fg_ref[...] = onehot


# --------------------------- Kernel 2: Lovasz + WCE ---------------------------
# inputs are sorted (descending error) per class along the points axis.
# grid over P tiles with per-class running carries; scalars finalized at the last step.
def _lovasz_kernel(points_num, neg_err_ref, fg_ref, gts_ref, nll_ref, losses_ref,
                   carry_fg, carry_jac, loss_acc):
    i = pl.program_id(0)
    C, TP = fg_ref.shape

    @pl.when(i == 0)
    def _():
        carry_fg[...] = jnp.zeros_like(carry_fg)
        carry_jac[...] = jnp.zeros_like(carry_jac)
        loss_acc[...] = jnp.zeros_like(loss_acc)

    fg = fg_ref[...]                                 # (C, TP) in {0,1}, sorted by desc. error
    err = -neg_err_ref[...]                          # undo key negation from lax.sort glue
    gts = gts_ref[...]                               # (C, 1) total per-class fg counts

    col = jax.lax.broadcasted_iota(jnp.int32, (C, TP), 1)

    # inclusive per-tile cumsum of fg along points (lanes): log-step roll-and-add (XLU),
    # no (P,P) operands and no MXU work.
    cum = fg
    d = 1
    while d < TP:
        cum = cum + jnp.where(col >= d, pltpu.roll(cum, shift=d, axis=1), 0.0)
        d *= 2
    cum_fg = cum + carry_fg[...]                     # add prefix carried from previous tiles

    # cumsum(1 - fg) analytically: (global position + 1) - cum_fg  (exact for P < 2^24)
    gcol = (col + i * TP + 1).astype(jnp.float32)
    cum_not = gcol - cum_fg

    intersection = gts - cum_fg
    union = gts + cum_not                            # always >= 1, no divide-by-zero
    jaccard = 1.0 - intersection / union

    # prev[j] = jaccard[j-1]; position 0 uses the carried last-jaccard of the previous tile
    prev = jnp.where(col == 0, carry_jac[...], pltpu.roll(jaccard, shift=1, axis=1))
    grad = jaccard - prev                            # Lovasz gradient

    loss_acc[...] += jnp.sum(err * grad, axis=1, keepdims=True)          # (C, 1)
    carry_fg[...] = cum_fg[:, TP - 1:TP]
    carry_jac[...] = jaccard[:, TP - 1:TP]

    @pl.when(i == pl.num_programs(0) - 1)
    def _():
        present = (gts > 0.0).astype(jnp.float32)                        # 'present' classes
        loss_ls = jnp.sum(loss_acc[...] * present) / jnp.sum(present)

        # dynamic class weights + weighted cross-entropy ('mean' reduction with weights)
        weight = 1.0 / (gts / jnp.float32(points_num) + EPS)             # (C, 1)
        wce_num = jnp.sum(weight * nll_ref[...])
        wce_den = jnp.sum(weight * gts)
        loss_wce = wce_num / wce_den

        losses_ref[0] = loss_wce
        losses_ref[1] = loss_ls
        losses_ref[2] = jnp.float32(0.0)                                 # with_tc=False
        losses_ref[3] = loss_wce + 2.0 * loss_ls


# ------------------------------- Wrapper -------------------------------------
def cpgnet_criterion(predict, target, tile_p=2048):
    """predict: [P, C] float logits, target: [P] int labels in [0, C)."""
    P, C = predict.shape
    predict = predict.astype(jnp.float32)
    target = target.astype(jnp.int32)

    # lane-dense layout: classes on sublanes, points on lanes
    logits = predict.T                               # (C, P)
    tgt = target.reshape(1, P)

    def round_up(a, b):
        return ((a + b - 1) // b) * b

    tp = min(tile_p, round_up(P, 128))
    P_pad = round_up(P, tp)
    if P_pad != P:
        logits = jnp.pad(logits, ((0, 0), (0, P_pad - P)))
        tgt = jnp.pad(tgt, ((0, 0), (0, P_pad - P)), constant_values=-1)

    grid = (P_pad // tp,)
    cparams = pltpu.CompilerParams(
        dimension_semantics=("arbitrary",),          # resident accumulators => sequential axis
        vmem_limit_bytes=32 * 1024 * 1024,           # explicit, safe on v5e/v6e/v7x
    )

    errors, fg, counts, nll_sum = pl.pallas_call(
        _prep_kernel,
        grid=grid,
        in_specs=[
            pl.BlockSpec((C, tp), lambda i: (0, i)),
            pl.BlockSpec((1, tp), lambda i: (0, i)),
        ],
        out_specs=(
            pl.BlockSpec((C, tp), lambda i: (0, i)),
            pl.BlockSpec((C, tp), lambda i: (0, i)),
            pl.BlockSpec((C, 1), lambda i: (0, 0)),
            pl.BlockSpec((C, 1), lambda i: (0, 0)),
        ),
        out_shape=(
            jax.ShapeDtypeStruct((C, P_pad), jnp.float32),
            jax.ShapeDtypeStruct((C, P_pad), jnp.float32),
            jax.ShapeDtypeStruct((C, 1), jnp.float32),
            jax.ShapeDtypeStruct((C, 1), jnp.float32),
        ),
        compiler_params=cparams,
    )(logits, tgt)

    # Per-class descending sort along the points axis: ONE multi-operand stable sort
    # (key = -errors ascending == errors descending), fg carried as a value.
    neg_err_sorted, fg_sorted = jax.lax.sort(
        (-errors, fg), dimension=1, num_keys=1, is_stable=True)

    losses = pl.pallas_call(
        functools.partial(_lovasz_kernel, P),
        grid=grid,
        in_specs=[
            pl.BlockSpec((C, tp), lambda i: (0, i)),
            pl.BlockSpec((C, tp), lambda i: (0, i)),
            pl.BlockSpec((C, 1), lambda i: (0, 0)),
            pl.BlockSpec((C, 1), lambda i: (0, 0)),
        ],
        out_specs=pl.BlockSpec(memory_space=pltpu.MemorySpace.SMEM),
        out_shape=jax.ShapeDtypeStruct((4,), jnp.float32),
        scratch_shapes=[
            pltpu.VMEM((C, 1), jnp.float32),         # carry: running cumsum(fg)
            pltpu.VMEM((C, 1), jnp.float32),         # carry: last jaccard of previous tile
            pltpu.VMEM((C, 1), jnp.float32),         # per-class loss accumulator
        ],
        compiler_params=cparams,
    )(neg_err_sorted, fg_sorted, counts, nll_sum)

    return {
        'loss_wce': losses[0],
        'loss_ls': losses[1],
        'loss_tc': losses[2],
        'loss': losses[3],
    }


# ---------------------------- Pure-JAX reference -----------------------------
def _reference(predict, target):
    P, C = predict.shape
    onehot = jax.nn.one_hot(target, C, dtype=jnp.float32)
    counts = onehot.sum(0)
    weight = 1.0 / (counts / P + EPS)
    logp = jax.nn.log_softmax(predict, -1)
    w_i = weight[target]
    nll = -jnp.take_along_axis(logp, target[:, None], 1)[:, 0]
    loss_wce = jnp.sum(w_i * nll) / jnp.sum(w_i)

    probs = jax.nn.softmax(predict, -1)
    errors = jnp.abs(onehot - probs)
    perm = jnp.argsort(-errors, axis=0)
    es = jnp.take_along_axis(errors, perm, 0)
    fgs = jnp.take_along_axis(onehot, perm, 0)
    gts = fgs.sum(0)
    inter = gts - jnp.cumsum(fgs, 0)
    union = gts + jnp.cumsum(1.0 - fgs, 0)
    jac = 1.0 - inter / union
    grad = jnp.concatenate([jac[:1], jac[1:] - jac[:-1]], 0)
    per_class = jnp.sum(es * grad, 0)
    present = (counts > 0).astype(jnp.float32)
    loss_ls = jnp.sum(per_class * present) / jnp.sum(present)
    return loss_wce, loss_ls, loss_wce + 2.0 * loss_ls


# --------------------------------- Main ---------------------------------------
if __name__ == "__main__":
    P, C = 1000, 8  # P not a multiple of the tile and one absent class -> exercises padding + 'present'
    key = jax.random.PRNGKey(0)
    k1, k2 = jax.random.split(key)
    predict = jax.random.normal(k1, (P, C), dtype=jnp.float32)
    target = jax.random.randint(k2, (P,), 0, C - 1, dtype=jnp.int32)  # class C-1 never present

    fn = jax.jit(functools.partial(cpgnet_criterion, tile_p=256))     # 4 grid steps at this size
    out = fn(predict, target)
    jax.block_until_ready(out)

    ref_wce, ref_ls, ref_loss = _reference(predict, target)
    assert jnp.allclose(out['loss_wce'], ref_wce, rtol=1e-4, atol=1e-4), (out['loss_wce'], ref_wce)
    assert jnp.allclose(out['loss_ls'], ref_ls, rtol=1e-4, atol=1e-4), (out['loss_ls'], ref_ls)
    assert jnp.allclose(out['loss'], ref_loss, rtol=1e-4, atol=1e-4), (out['loss'], ref_loss)
    assert jnp.isfinite(out['loss'])
    print("KERNEL_OK")
</pallas_src>

<mosaic_0001>
module attributes {stable_mosaic.version = 11 : i64} {
  func.func @_prep_kernel(%arg0: i32, %arg1: memref<8x256xf32, #tpu.memory_space<vmem>>, %arg2: memref<1x256xi32, #tpu.memory_space<vmem>>, %arg3: memref<8x256xf32, #tpu.memory_space<vmem>>, %arg4: memref<8x256xf32, #tpu.memory_space<vmem>>, %arg5: memref<8x1xf32, #tpu.memory_space<vmem>>, %arg6: memref<8x1xf32, #tpu.memory_space<vmem>>) attributes {dimension_semantics = [#tpu.dimension_semantics<arbitrary>], iteration_bounds = array<i64: 4>, scalar_prefetch = 0 : i64, scratch_operands = 0 : i64, tpu.core_type = #tpu.core_type<tc>, window_params = [{transform_indices = @transform_0, window_bounds = array<i64: 8, 256>}, {transform_indices = @transform_1, window_bounds = array<i64: 1, 256>}, {transform_indices = @transform_2, window_bounds = array<i64: 8, 256>}, {transform_indices = @transform_3, window_bounds = array<i64: 8, 256>}, {pipeline_mode = #tpu.pipeline_mode<synchronous>, transform_indices = @transform_4, window_bounds = array<i64: 8, 1>}, {pipeline_mode = #tpu.pipeline_mode<synchronous>, transform_indices = @transform_5, window_bounds = array<i64: 8, 1>}]} {
    %c0 = arith.constant 0 : index
    %c0_0 = arith.constant 0 : index
    %0 = vector.load %arg1[%c0, %c0_0] : memref<8x256xf32, #tpu.memory_space<vmem>>, vector<8x256xf32>
    %c0_1 = arith.constant 0 : index
    %c0_2 = arith.constant 0 : index
    %1 = vector.load %arg2[%c0_1, %c0_2] : memref<1x256xi32, #tpu.memory_space<vmem>>, vector<1x256xi32>
    %2 = tpu.iota {dimensions = array<i32: 0>} : vector<8x256xi32>
    %3 = vector.broadcast %1 : vector<1x256xi32> to vector<8x256xi32>
    %4 = arith.cmpi eq, %3, %2 : vector<8x256xi32>
    %5 = arith.extui %4 : vector<8x256xi1> to vector<8x256xi32>
    %6 = arith.sitofp %5 : vector<8x256xi32> to vector<8x256xf32>
    %c0_i32 = arith.constant 0 : i32
    %7 = vector.broadcast %c0_i32 : i32 to vector<1x256xi32>
    %8 = arith.cmpi sge, %1, %7 : vector<1x256xi32>
    %cst = arith.constant dense<0xFF800000> : vector<256xf32>
    %9 = vector.multi_reduction <maximumf>, %0, %cst [0] : vector<8x256xf32> to vector<256xf32>
    %10 = vector.shape_cast %9 : vector<256xf32> to vector<1x256xf32>
    %11 = vector.broadcast %10 : vector<1x256xf32> to vector<8x256xf32>
    %12 = arith.subf %0, %11 : vector<8x256xf32>
    %13 = math.exp %12 : vector<8x256xf32>
    %cst_3 = arith.constant dense<0.000000e+00> : vector<256xf32>
    %14 = vector.multi_reduction <add>, %13, %cst_3 [0] : vector<8x256xf32> to vector<256xf32>
    %15 = vector.shape_cast %14 : vector<256xf32> to vector<1x256xf32>
    %16 = vector.broadcast %15 : vector<1x256xf32> to vector<8x256xf32>
    %17 = arith.divf %13, %16 : vector<8x256xf32>
    %18 = vector.broadcast %10 : vector<1x256xf32> to vector<8x256xf32>
    %19 = arith.subf %0, %18 : vector<8x256xf32>
    %20 = math.log %15 : vector<1x256xf32>
    %21 = vector.broadcast %20 : vector<1x256xf32> to vector<8x256xf32>
    %22 = arith.subf %19, %21 : vector<8x256xf32>
    %c0_i32_4 = arith.constant 0 : i32
    %23 = arith.cmpi eq, %arg0, %c0_i32_4 : i32
    %24 = arith.extui %23 : i1 to i32
    %c0_i32_5 = arith.constant 0 : i32
    %25 = arith.cmpi ne, %24, %c0_i32_5 : i32
    scf.if %25 {
      %cst_22 = arith.constant 0.000000e+00 : f32
      %47 = vector.broadcast %cst_22 : f32 to vector<8x1xf32>
      %c0_23 = arith.constant 0 : index
      %c0_24 = arith.constant 0 : index
      %48 = vector.load %arg5[%c0_23, %c0_24] : memref<8x1xf32, #tpu.memory_space<vmem>>, vector<8x1xf32>
      tpu.vector_store %arg5[%c0_23, %c0_24], %47 {strides = array<i32>} : memref<8x1xf32, #tpu.memory_space<vmem>>, vector<8x1xf32>,
      %cst_25 = arith.constant 0.000000e+00 : f32
      %49 = vector.broadcast %cst_25 : f32 to vector<8x1xf32>
      %c0_26 = arith.constant 0 : index
      %c0_27 = arith.constant 0 : index
      %50 = vector.load %arg6[%c0_26, %c0_27] : memref<8x1xf32, #tpu.memory_space<vmem>>, vector<8x1xf32>
      tpu.vector_store %arg6[%c0_26, %c0_27], %49 {strides = array<i32>} : memref<8x1xf32, #tpu.memory_space<vmem>>, vector<8x1xf32>,
    } else {
    }
    %c0_6 = arith.constant 0 : index
    %c0_7 = arith.constant 0 : index
    %26 = vector.load %arg5[%c0_6, %c0_7] : memref<8x1xf32, #tpu.memory_space<vmem>>, vector<8x1xf32>
    %cst_8 = arith.constant dense<0.000000e+00> : vector<8xf32>
    %27 = vector.multi_reduction <add>, %6, %cst_8 [1] : vector<8x256xf32> to vector<8xf32>
    %28 = vector.shape_cast %27 : vector<8xf32> to vector<8x1xf32>
    %29 = arith.addf %26, %28 : vector<8x1xf32>
    %c0_9 = arith.constant 0 : index
    %c0_10 = arith.constant 0 : index
    %30 = vector.load %arg5[%c0_9, %c0_10] : memref<8x1xf32, #tpu.memory_space<vmem>>, vector<8x1xf32>
    tpu.vector_store %arg5[%c0_9, %c0_10], %29 {strides = array<i32>} : memref<8x1xf32, #tpu.memory_space<vmem>>, vector<8x1xf32>,
    %c0_11 = arith.constant 0 : index
    %c0_12 = arith.constant 0 : index
    %31 = vector.load %arg6[%c0_11, %c0_12] : memref<8x1xf32, #tpu.memory_space<vmem>>, vector<8x1xf32>
    %32 = arith.mulf %6, %22 : vector<8x256xf32>
    %cst_13 = arith.constant dense<0.000000e+00> : vector<8xf32>
    %33 = vector.multi_reduction <add>, %32, %cst_13 [1] : vector<8x256xf32> to vector<8xf32>
    %34 = vector.shape_cast %33 : vector<8xf32> to vector<8x1xf32>
    %cst_14 = arith.constant 0.000000e+00 : f32
    %35 = vector.broadcast %cst_14 : f32 to vector<8x1xf32>
    %36 = arith.subf %35, %34 : vector<8x1xf32>
    %37 = arith.addf %31, %36 : vector<8x1xf32>
    %c0_15 = arith.constant 0 : index
    %c0_16 = arith.constant 0 : index
    %38 = vector.load %arg6[%c0_15, %c0_16] : memref<8x1xf32, #tpu.memory_space<vmem>>, vector<8x1xf32>
    tpu.vector_store %arg6[%c0_15, %c0_16], %37 {strides = array<i32>} : memref<8x1xf32, #tpu.memory_space<vmem>>, vector<8x1xf32>,
    %39 = arith.subf %6, %17 : vector<8x256xf32>
    %40 = math.absf %39 : vector<8x256xf32>
    %cst_17 = arith.constant 0.000000e+00 : f32
    %41 = vector.shape_cast %8 : vector<1x256xi1> to vector<1x256xi1>
    %42 = vector.broadcast %41 : vector<1x256xi1> to vector<8x256xi1>
    %43 = vector.broadcast %cst_17 : f32 to vector<8x256xf32>
    %44 = arith.select %42, %40, %43 : vector<8x256xi1>, vector<8x256xf32>
    %c0_18 = arith.constant 0 : index
    %c0_19 = arith.constant 0 : index
    %45 = vector.load %arg3[%c0_18, %c0_19] : memref<8x256xf32, #tpu.memory_space<vmem>>, vector<8x256xf32>
    tpu.vector_store %arg3[%c0_18, %c0_19], %44 {strides = array<i32>} : memref<8x256xf32, #tpu.memory_space<vmem>>, vector<8x256xf32>,
    %c0_20 = arith.constant 0 : index
    %c0_21 = arith.constant 0 : index
    %46 = vector.load %arg4[%c0_20, %c0_21] : memref<8x256xf32, #tpu.memory_space<vmem>>, vector<8x256xf32>
    tpu.vector_store %arg4[%c0_20, %c0_21], %6 {strides = array<i32>} : memref<8x256xf32, #tpu.memory_space<vmem>>, vector<8x256xf32>,
    return
  }
  func.func @transform_0(%arg0: i32) -> (i32, i32) {
    %c0_i32 = arith.constant 0 : i32
    %c0_i32_0 = arith.constant 0 : i32
    return %c0_i32, %arg0 : i32, i32
  }
  func.func @transform_1(%arg0: i32) -> (i32, i32) {
    %c0_i32 = arith.constant 0 : i32
    %c0_i32_0 = arith.constant 0 : i32
    return %c0_i32, %arg0 : i32, i32
  }
  func.func @transform_2(%arg0: i32) -> (i32, i32) {
    %c0_i32 = arith.constant 0 : i32
    %c0_i32_0 = arith.constant 0 : i32
    return %c0_i32, %arg0 : i32, i32
  }
  func.func @transform_3(%arg0: i32) -> (i32, i32) {
    %c0_i32 = arith.constant 0 : i32
    %c0_i32_0 = arith.constant 0 : i32
    return %c0_i32, %arg0 : i32, i32
  }
  func.func @transform_4(%arg0: i32) -> (i32, i32) {
    %c0_i32 = arith.constant 0 : i32
    %c0_i32_0 = arith.constant 0 : i32
    %c0_i32_1 = arith.constant 0 : i32
    return %c0_i32, %c0_i32_0 : i32, i32
  }
  func.func @transform_5(%arg0: i32) -> (i32, i32) {
    %c0_i32 = arith.constant 0 : i32
    %c0_i32_0 = arith.constant 0 : i32
    %c0_i32_1 = arith.constant 0 : i32
    return %c0_i32, %c0_i32_0 : i32, i32
  }
}

module attributes {stable_mosaic.version = 11 : i64} {
  func.func @_lovasz_kernel(%arg0: i32, %arg1: memref<8x256xf32, #tpu.memory_space<vmem>>, %arg2: memref<8x256xf32, #tpu.memory_space<vmem>>, %arg3: memref<8x1xf32, #tpu.memory_space<vmem>>, %arg4: memref<8x1xf32, #tpu.memory_space<vmem>>, %arg5: memref<4xf32, #tpu.memory_space<smem>>, %arg6: memref<8x1xf32, #tpu.memory_space<vmem>>, %arg7: memref<8x1xf32, #tpu.memory_space<vmem>>, %arg8: memref<8x1xf32, #tpu.memory_space<vmem>>) attributes {dimension_semantics = [#tpu.dimension_semantics<arbitrary>], iteration_bounds = array<i64: 4>, scalar_prefetch = 0 : i64, scratch_operands = 3 : i64, tpu.core_type = #tpu.core_type<tc>, window_params = [{transform_indices = @transform_0, window_bounds = array<i64: 8, 256>}, {transform_indices = @transform_1, window_bounds = array<i64: 8, 256>}, {pipeline_mode = #tpu.pipeline_mode<synchronous>, transform_indices = @transform_2, window_bounds = array<i64: 8, 1>}, {pipeline_mode = #tpu.pipeline_mode<synchronous>, transform_indices = @transform_3, window_bounds = array<i64: 8, 1>}, {transform_indices = @transform_4, window_bounds = array<i64: 4>}]} {
    %c0_i32 = arith.constant 0 : i32
    %0 = arith.cmpi eq, %arg0, %c0_i32 : i32
    %1 = arith.extui %0 : i1 to i32
    %c0_i32_0 = arith.constant 0 : i32
    %2 = arith.cmpi ne, %1, %c0_i32_0 : i32
    scf.if %2 {
      %cst_40 = arith.constant 0.000000e+00 : f32
      %95 = vector.broadcast %cst_40 : f32 to vector<8x1xf32>
      %c0_41 = arith.constant 0 : index
      %c0_42 = arith.constant 0 : index
      %96 = vector.load %arg6[%c0_41, %c0_42] : memref<8x1xf32, #tpu.memory_space<vmem>>, vector<8x1xf32>
      tpu.vector_store %arg6[%c0_41, %c0_42], %95 {strides = array<i32>} : memref<8x1xf32, #tpu.memory_space<vmem>>, vector<8x1xf32>,
      %cst_43 = arith.constant 0.000000e+00 : f32
      %97 = vector.broadcast %cst_43 : f32 to vector<8x1xf32>
      %c0_44 = arith.constant 0 : index
      %c0_45 = arith.constant 0 : index
      %98 = vector.load %arg7[%c0_44, %c0_45] : memref<8x1xf32, #tpu.memory_space<vmem>>, vector<8x1xf32>
      tpu.vector_store %arg7[%c0_44, %c0_45], %97 {strides = array<i32>} : memref<8x1xf32, #tpu.memory_space<vmem>>, vector<8x1xf32>,
      %cst_46 = arith.constant 0.000000e+00 : f32
      %99 = vector.broadcast %cst_46 : f32 to vector<8x1xf32>
      %c0_47 = arith.constant 0 : index
      %c0_48 = arith.constant 0 : index
      %100 = vector.load %arg8[%c0_47, %c0_48] : memref<8x1xf32, #tpu.memory_space<vmem>>, vector<8x1xf32>
      tpu.vector_store %arg8[%c0_47, %c0_48], %99 {strides = array<i32>} : memref<8x1xf32, #tpu.memory_space<vmem>>, vector<8x1xf32>,
    } else {
    }
    %c0 = arith.constant 0 : index
    %c0_1 = arith.constant 0 : index
    %3 = vector.load %arg2[%c0, %c0_1] : memref<8x256xf32, #tpu.memory_space<vmem>>, vector<8x256xf32>
    %c0_2 = arith.constant 0 : index
    %c0_3 = arith.constant 0 : index
    %4 = vector.load %arg1[%c0_2, %c0_3] : memref<8x256xf32, #tpu.memory_space<vmem>>, vector<8x256xf32>
    %cst = arith.constant 0.000000e+00 : f32
    %5 = vector.broadcast %cst : f32 to vector<8x256xf32>
    %6 = arith.subf %5, %4 : vector<8x256xf32>
    %c0_4 = arith.constant 0 : index
    %c0_5 = arith.constant 0 : index
    %7 = vector.load %arg3[%c0_4, %c0_5] : memref<8x1xf32, #tpu.memory_space<vmem>>, vector<8x1xf32>
    %8 = tpu.iota {dimensions = array<i32: 1>} : vector<8x256xi32>
    %c1_i32 = arith.constant 1 : i32
    %9 = vector.broadcast %c1_i32 : i32 to vector<8x256xi32>
    %10 = arith.cmpi sge, %8, %9 : vector<8x256xi32>
    %c1_i32_6 = arith.constant 1 : i32
    %11 = tpu.dynamic_rotate %3 by %c1_i32_6 dim 1 : vector<8x256xf32>, i32 -> vector<8x256xf32>
    %cst_7 = arith.constant 0.000000e+00 : f32
    %12 = vector.broadcast %cst_7 : f32 to vector<8x256xf32>
    %13 = arith.select %10, %11, %12 : vector<8x256xi1>, vector<8x256xf32>
    %14 = arith.addf %3, %13 : vector<8x256xf32>
    %c2_i32 = arith.constant 2 : i32
    %15 = vector.broadcast %c2_i32 : i32 to vector<8x256xi32>
    %16 = arith.cmpi sge, %8, %15 : vector<8x256xi32>
    %c2_i32_8 = arith.constant 2 : i32
    %17 = tpu.dynamic_rotate %14 by %c2_i32_8 dim 1 : vector<8x256xf32>, i32 -> vector<8x256xf32>
    %cst_9 = arith.constant 0.000000e+00 : f32
    %18 = vector.broadcast %cst_9 : f32 to vector<8x256xf32>
    %19 = arith.select %16, %17, %18 : vector<8x256xi1>, vector<8x256xf32>
    %20 = arith.addf %14, %19 : vector<8x256xf32>
    %c4_i32 = arith.constant 4 : i32
    %21 = vector.broadcast %c4_i32 : i32 to vector<8x256xi32>
    %22 = arith.cmpi sge, %8, %21 : vector<8x256xi32>
    %c4_i32_10 = arith.constant 4 : i32
    %23 = tpu.dynamic_rotate %20 by %c4_i32_10 dim 1 : vector<8x256xf32>, i32 -> vector<8x256xf32>
    %cst_11 = arith.constant 0.000000e+00 : f32
    %24 = vector.broadcast %cst_11 : f32 to vector<8x256xf32>
    %25 = arith.select %22, %23, %24 : vector<8x256xi1>, vector<8x256xf32>
    %26 = arith.addf %20, %25 : vector<8x256xf32>
    %c8_i32 = arith.constant 8 : i32
    %27 = vector.broadcast %c8_i32 : i32 to vector<8x256xi32>
    %28 = arith.cmpi sge, %8, %27 : vector<8x256xi32>
    %c8_i32_12 = arith.constant 8 : i32
    %29 = tpu.dynamic_rotate %26 by %c8_i32_12 dim 1 : vector<8x256xf32>, i32 -> vector<8x256xf32>
    %cst_13 = arith.constant 0.000000e+00 : f32
    %30 = vector.broadcast %cst_13 : f32 to vector<8x256xf32>
    %31 = arith.select %28, %29, %30 : vector<8x256xi1>, vector<8x256xf32>
    %32 = arith.addf %26, %31 : vector<8x256xf32>
    %c16_i32 = arith.constant 16 : i32
    %33 = vector.broadcast %c16_i32 : i32 to vector<8x256xi32>
    %34 = arith.cmpi sge, %8, %33 : vector<8x256xi32>
    %c16_i32_14 = arith.constant 16 : i32
    %35 = tpu.dynamic_rotate %32 by %c16_i32_14 dim 1 : vector<8x256xf32>, i32 -> vector<8x256xf32>
    %cst_15 = arith.constant 0.000000e+00 : f32
    %36 = vector.broadcast %cst_15 : f32 to vector<8x256xf32>
    %37 = arith.select %34, %35, %36 : vector<8x256xi1>, vector<8x256xf32>
    %38 = arith.addf %32, %37 : vector<8x256xf32>
    %c32_i32 = arith.constant 32 : i32
    %39 = vector.broadcast %c32_i32 : i32 to vector<8x256xi32>
    %40 = arith.cmpi sge, %8, %39 : vector<8x256xi32>
    %c32_i32_16 = arith.constant 32 : i32
    %41 = tpu.dynamic_rotate %38 by %c32_i32_16 dim 1 : vector<8x256xf32>, i32 -> vector<8x256xf32>
    %cst_17 = arith.constant 0.000000e+00 : f32
    %42 = vector.broadcast %cst_17 : f32 to vector<8x256xf32>
    %43 = arith.select %40, %41, %42 : vector<8x256xi1>, vector<8x256xf32>
    %44 = arith.addf %38, %43 : vector<8x256xf32>
    %c64_i32 = arith.constant 64 : i32
    %45 = vector.broadcast %c64_i32 : i32 to vector<8x256xi32>
    %46 = arith.cmpi sge, %8, %45 : vector<8x256xi32>
    %c64_i32_18 = arith.constant 64 : i32
    %47 = tpu.dynamic_rotate %44 by %c64_i32_18 dim 1 : vector<8x256xf32>, i32 -> vector<8x256xf32>
    %cst_19 = arith.constant 0.000000e+00 : f32
    %48 = vector.broadcast %cst_19 : f32 to vector<8x256xf32>
    %49 = arith.select %46, %47, %48 : vector<8x256xi1>, vector<8x256xf32>
    %50 = arith.addf %44, %49 : vector<8x256xf32>
    %c128_i32 = arith.constant 128 : i32
    %51 = vector.broadcast %c128_i32 : i32 to vector<8x256xi32>
    %52 = arith.cmpi sge, %8, %51 : vector<8x256xi32>
    %c128_i32_20 = arith.constant 128 : i32
    %53 = tpu.dynamic_rotate %50 by %c128_i32_20 dim 1 : vector<8x256xf32>, i32 -> vector<8x256xf32>
    %cst_21 = arith.constant 0.000000e+00 : f32
    %54 = vector.broadcast %cst_21 : f32 to vector<8x256xf32>
    %55 = arith.select %52, %53, %54 : vector<8x256xi1>, vector<8x256xf32>
    %56 = arith.addf %50, %55 : vector<8x256xf32>
    %c0_22 = arith.constant 0 : index
    %c0_23 = arith.constant 0 : index
    %57 = vector.load %arg6[%c0_22, %c0_23] : memref<8x1xf32, #tpu.memory_space<vmem>>, vector<8x1xf32>
    %58 = vector.broadcast %57 : vector<8x1xf32> to vector<8x256xf32>
    %59 = arith.addf %56, %58 : vector<8x256xf32>
    %c256_i32 = arith.constant 256 : i32
    %60 = arith.muli %arg0, %c256_i32 : i32
    %61 = vector.broadcast %60 : i32 to vector<8x256xi32>
    %62 = arith.addi %8, %61 : vector<8x256xi32>
    %c1_i32_24 = arith.constant 1 : i32
    %63 = vector.broadcast %c1_i32_24 : i32 to vector<8x256xi32>
    %64 = arith.addi %62, %63 : vector<8x256xi32>
    %65 = arith.sitofp %64 : vector<8x256xi32> to vector<8x256xf32>
    %66 = arith.subf %65, %59 : vector<8x256xf32>
    %67 = vector.broadcast %7 : vector<8x1xf32> to vector<8x256xf32>
    %68 = arith.subf %67, %59 : vector<8x256xf32>
    %69 = vector.broadcast %7 : vector<8x1xf32> to vector<8x256xf32>
    %70 = arith.addf %69, %66 : vector<8x256xf32>
    %71 = arith.divf %68, %70 : vector<8x256xf32>
    %cst_25 = arith.constant 1.000000e+00 : f32
    %72 = vector.broadcast %cst_25 : f32 to vector<8x256xf32>
    %73 = arith.subf %72, %71 : vector<8x256xf32>
    %c0_i32_26 = arith.constant 0 : i32
    %74 = vector.broadcast %c0_i32_26 : i32 to vector<8x256xi32>
    %75 = arith.cmpi eq, %8, %74 : vector<8x256xi32>
    %c0_27 = arith.constant 0 : index
    %c0_28 = arith.constant 0 : index
    %76 = vector.load %arg7[%c0_27, %c0_28] : memref<8x1xf32, #tpu.memory_space<vmem>>, vector<8x1xf32>
    %c1_i32_29 = arith.constant 1 : i32
    %77 = tpu.dynamic_rotate %73 by %c1_i32_29 dim 1 : vector<8x256xf32>, i32 -> vector<8x256xf32>
    %78 = vector.shape_cast %76 : vector<8x1xf32> to vector<8x1xf32>
    %79 = vector.broadcast %78 : vector<8x1xf32> to vector<8x256xf32>
    %80 = arith.select %75, %79, %77 : vector<8x256xi1>, vector<8x256xf32>
    %81 = arith.subf %73, %80 : vector<8x256xf32>
    %c0_30 = arith.constant 0 : index
    %c0_31 = arith.constant 0 : index
    %82 = vector.load %arg8[%c0_30, %c0_31] : memref<8x1xf32, #tpu.memory_space<vmem>>, vector<8x1xf32>
    %83 = arith.mulf %6, %81 : vector<8x256xf32>
    %cst_32 = arith.constant dense<0.000000e+00> : vector<8xf32>
    %84 = vector.multi_reduction <add>, %83, %cst_32 [1] : vector<8x256xf32> to vector<8xf32>
    %85 = vector.shape_cast %84 : vector<8xf32> to vector<8x1xf32>
    %86 = arith.addf %82, %85 : vector<8x1xf32>
    %c0_33 = arith.constant 0 : index
    %c0_34 = arith.constant 0 : index
    %87 = vector.load %arg8[%c0_33, %c0_34] : memref<8x1xf32, #tpu.memory_space<vmem>>, vector<8x1xf32>
    tpu.vector_store %arg8[%c0_33, %c0_34], %86 {strides = array<i32>} : memref<8x1xf32, #tpu.memory_space<vmem>>, vector<8x1xf32>,
    %88 = vector.extract_strided_slice %59 {offsets = [0, 255], sizes = [8, 1], strides = [1, 1]} : vector<8x256xf32> to vector<8x1xf32>
    %c0_35 = arith.constant 0 : index
    %c0_36 = arith.constant 0 : index
    %89 = vector.load %arg6[%c0_35, %c0_36] : memref<8x1xf32, #tpu.memory_space<vmem>>, vector<8x1xf32>
    tpu.vector_store %arg6[%c0_35, %c0_36], %88 {strides = array<i32>} : memref<8x1xf32, #tpu.memory_space<vmem>>, vector<8x1xf32>,
    %90 = vector.extract_strided_slice %73 {offsets = [0, 255], sizes = [8, 1], strides = [1, 1]} : vector<8x256xf32> to vector<8x1xf32>
    %c0_37 = arith.constant 0 : index
    %c0_38 = arith.constant 0 : index
    %91 = vector.load %arg7[%c0_37, %c0_38] : memref<8x1xf32, #tpu.memory_space<vmem>>, vector<8x1xf32>
    tpu.vector_store %arg7[%c0_37, %c0_38], %90 {strides = array<i32>} : memref<8x1xf32, #tpu.memory_space<vmem>>, vector<8x1xf32>,
    %c3_i32 = arith.constant 3 : i32
    %92 = arith.cmpi eq, %arg0, %c3_i32 : i32
    %93 = arith.extui %92 : i1 to i32
    %c0_i32_39 = arith.constant 0 : i32
    %94 = arith.cmpi ne, %93, %c0_i32_39 : i32
    scf.if %94 {
      %cst_40 = arith.constant 0.000000e+00 : f32
      %95 = vector.broadcast %cst_40 : f32 to vector<8x1xf32>
      %96 = arith.cmpf ogt, %7, %95 : vector<8x1xf32>
      %97 = arith.extui %96 : vector<8x1xi1> to vector<8x1xi32>
      %98 = arith.sitofp %97 : vector<8x1xi32> to vector<8x1xf32>
      %c0_41 = arith.constant 0 : index
      %c0_42 = arith.constant 0 : index
      %99 = vector.load %arg8[%c0_41, %c0_42] : memref<8x1xf32, #tpu.memory_space<vmem>>, vector<8x1xf32>
      %100 = arith.mulf %99, %98 : vector<8x1xf32>
      %101 = vector.shape_cast %100 : vector<8x1xf32> to vector<1x8x1xf32>
      %cst_43 = arith.constant dense<0.000000e+00> : vector<1xf32>
      %102 = vector.multi_reduction <add>, %101, %cst_43 [1, 2] : vector<1x8x1xf32> to vector<1xf32>
      %103 = vector.shape_cast %102 : vector<1xf32> to vector<1x1x1xf32>
      %104 = vector.extract %103[0, 0, 0] : f32 from vector<1x1x1xf32>
      %105 = vector.shape_cast %98 : vector<8x1xf32> to vector<1x8x1xf32>
      %cst_44 = arith.constant dense<0.000000e+00> : vector<1xf32>
      %106 = vector.multi_reduction <add>, %105, %cst_44 [1, 2] : vector<1x8x1xf32> to vector<1xf32>
      %107 = vector.shape_cast %106 : vector<1xf32> to vector<1x1x1xf32>
      %108 = vector.extract %107[0, 0, 0] : f32 from vector<1x1x1xf32>
      %109 = arith.divf %104, %108 : f32
      %cst_45 = arith.constant 1.000000e+03 : f32
      %110 = vector.broadcast %cst_45 : f32 to vector<8x1xf32>
      %111 = arith.divf %7, %110 : vector<8x1xf32>
      %cst_46 = arith.constant 1.000000e-03 : f32
      %112 = vector.broadcast %cst_46 : f32 to vector<8x1xf32>
      %113 = arith.addf %111, %112 : vector<8x1xf32>
      %cst_47 = arith.constant 1.000000e+00 : f32
      %114 = vector.broadcast %cst_47 : f32 to vector<8x1xf32>
      %115 = arith.divf %114, %113 : vector<8x1xf32>
      %c0_48 = arith.constant 0 : index
      %c0_49 = arith.constant 0 : index
      %116 = vector.load %arg4[%c0_48, %c0_49] : memref<8x1xf32, #tpu.memory_space<vmem>>, vector<8x1xf32>
      %117 = arith.mulf %115, %116 : vector<8x1xf32>
      %118 = vector.shape_cast %117 : vector<8x1xf32> to vector<1x8x1xf32>
      %cst_50 = arith.constant dense<0.000000e+00> : vector<1xf32>
      %119 = vector.multi_reduction <add>, %118, %cst_50 [1, 2] : vector<1x8x1xf32> to vector<1xf32>
      %120 = vector.shape_cast %119 : vector<1xf32> to vector<1x1x1xf32>
      %121 = vector.extract %120[0, 0, 0] : f32 from vector<1x1x1xf32>
      %122 = arith.mulf %115, %7 : vector<8x1xf32>
      %123 = vector.shape_cast %122 : vector<8x1xf32> to vector<1x8x1xf32>
      %cst_51 = arith.constant dense<0.000000e+00> : vector<1xf32>
      %124 = vector.multi_reduction <add>, %123, %cst_51 [1, 2] : vector<1x8x1xf32> to vector<1xf32>
      %125 = vector.shape_cast %124 : vector<1xf32> to vector<1x1x1xf32>
      %126 = vector.extract %125[0, 0, 0] : f32 from vector<1x1x1xf32>
      %127 = arith.divf %121, %126 : f32
      %c0_52 = arith.constant 0 : index
      %128 = memref.load %arg5[%c0_52] : memref<4xf32, #tpu.memory_space<smem>>
      memref.store %127, %arg5[%c0_52] : memref<4xf32, #tpu.memory_space<smem>>
      %c1 = arith.constant 1 : index
      %129 = memref.load %arg5[%c1] : memref<4xf32, #tpu.memory_space<smem>>
      memref.store %109, %arg5[%c1] : memref<4xf32, #tpu.memory_space<smem>>
      %cst_53 = arith.constant 0.000000e+00 : f32
      %c2 = arith.constant 2 : index
      %130 = memref.load %arg5[%c2] : memref<4xf32, #tpu.memory_space<smem>>
      memref.store %cst_53, %arg5[%c2] : memref<4xf32, #tpu.memory_space<smem>>
      %cst_54 = arith.constant 2.000000e+00 : f32
      %131 = arith.mulf %cst_54, %109 : f32
      %132 = arith.addf %127, %131 : f32
      %c3 = arith.constant 3 : index
      %133 = memref.load %arg5[%c3] : memref<4xf32, #tpu.memory_space<smem>>
      memref.store %132, %arg5[%c3] : memref<4xf32, #tpu.memory_space<smem>>
    } else {
    }
    return
  }
  func.func @transform_0(%arg0: i32) -> (i32, i32) {
    %c0_i32 = arith.constant 0 : i32
    %c0_i32_0 = arith.constant 0 : i32
    return %c0_i32, %arg0 : i32, i32
  }
  func.func @transform_1(%arg0: i32) -> (i32, i32) {
    %c0_i32 = arith.constant 0 : i32
    %c0_i32_0 = arith.constant 0 : i32
    return %c0_i32, %arg0 : i32, i32
  }
  func.func @transform_2(%arg0: i32) -> (i32, i32) {
    %c0_i32 = arith.constant 0 : i32
    %c0_i32_0 = arith.constant 0 : i32
    %c0_i32_1 = arith.constant 0 : i32
    return %c0_i32, %c0_i32_0 : i32, i32
  }
  func.func @transform_3(%arg0: i32) -> (i32, i32) {
    %c0_i32 = arith.constant 0 : i32
    %c0_i32_0 = arith.constant 0 : i32
    %c0_i32_1 = arith.constant 0 : i32
    return %c0_i32, %c0_i32_0 : i32, i32
  }
  func.func @transform_4(%arg0: i32) -> i32 {
    %c0_i32 = arith.constant 0 : i32
    %c0_i32_0 = arith.constant 0 : i32
    return %c0_i32 : i32
  }
}

</mosaic_0001>

<bundles_post_ra>
// kernel: neg.1
= control target key start
LH: loop header
LB: loop body
LE: loop exit
PB: predicated region body
PF: predicated region fallthrough
CT: control target
= control target key end

     0   :  { %s136_s0 = inlined_call_operand.vmem [shape: f32[8,1024], index: 0, kind: input, shape index: {}]   ;;  %s137_s1 = inlined_call_operand.vmem [shape: f32[8,1024], index: 1, kind: output, shape index: {}]  }
   0x1   :  { %v2_v0 = vld [vmem:[%s136_s0] sm:$0xff]  ;;  %v64_v1 = vld [vmem:[%s136_s0 + $0x8] sm:$0xff]  ;;  %v66_v2 = vld [vmem:[%s136_s0 + $0x10] sm:$0xff] }
   0x2   :  { %v5_v3 = vxor.u32 2147483648, %v2_v0  ;;  %v12_v4 = vxor.u32 2147483648, %v64_v1  ;;  %v20_v5 = vxor.u32 2147483648, %v66_v2  ;;  %v68_v6 = vld [vmem:[%s136_s0 + $0x18] sm:$0xff]  ;;  %v70_v7 = vld [vmem:[%s136_s0 + $0x20] sm:$0xff]  ;;  %v72_v8 = vld [vmem:[%s136_s0 + $0x28] sm:$0xff] }
   0x3   :  { %v28_v9 = vxor.u32 2147483648, %v68_v6  ;;  %v36_v10 = vxor.u32 2147483648, %v70_v7  ;;  %v44_v11 = vxor.u32 2147483648, %v72_v8  ;;  %v74_v12 = vld [vmem:[%s136_s0 + $0x30] sm:$0xff]  ;;  %v76_v13 = vld [vmem:[%s136_s0 + $0x38] sm:$0xff] }
   0x4   :  { %7 = vst [vmem:[%s137_s1] sm:$0xff] %v5_v3  ;;  %65 = vst [vmem:[%s137_s1 + $0x8] sm:$0xff] %v12_v4  ;;  %v52_v14 = vxor.u32 2147483648, %v74_v12  ;;  %v60_v15 = vxor.u32 2147483648, %v76_v13 }
   0x5   :  { %67 = vst [vmem:[%s137_s1 + $0x10] sm:$0xff] %v20_v5  ;;  %69 = vst [vmem:[%s137_s1 + $0x18] sm:$0xff] %v28_v9 }
   0x6   :  { %71 = vst [vmem:[%s137_s1 + $0x20] sm:$0xff] %v36_v10  ;;  %73 = vst [vmem:[%s137_s1 + $0x28] sm:$0xff] %v44_v11 }
   0x7   :  { %75 = vst [vmem:[%s137_s1 + $0x30] sm:$0xff] %v52_v14  ;;  %77 = vst [vmem:[%s137_s1 + $0x38] sm:$0xff] %v60_v15 }

// kernel: cpgnet_criterion.2
= control target key start
LH: loop header
LB: loop body
LE: loop exit
PB: predicated region body
PF: predicated region fallthrough
CT: control target
= control target key end

     0   :  { %s551_s18 = smov 0   ;;  %s637_s0 = inlined_call_operand.vmem [shape: f32[8,1024], index: 0, kind: input, shape index: {}]   ;;  %s638_s1 = inlined_call_operand.vmem [shape: s32[1,1024], index: 1, kind: input, shape index: {}]   ;;  %s639_s2 = inlined_call_operand.vmem [shape: f32[8,1024], index: 2, kind: output, shape index: {0}]   ;;  %s640_s3 = inlined_call_operand.vmem [shape: f32[8,1024], index: 3, kind: output, shape index: {1}]   ;;  %s641_s4 = inlined_call_operand.vmem [shape: f32[8,1], index: 4, kind: output, shape index: {2}]   ;;  %s642_s5 = inlined_call_operand.vmem [shape: f32[8,1], index: 5, kind: output, shape index: {3}]  }
   0x1 LB: > { %s470_s19 = sadd.s32 4294967295, %s516_s18   ;;  %p474_p0 = scmp.ge.s32.totalorder %s516_s18, 1  ;;  %s516_s18 = sphi %s551_s18, %s16_s18  }
   0x2   : > { %p195_p1 = scmp.lt.s32.totalorder %s516_s18, 5 }
   0x4   : > { %p196_p2 = pnand %p474_p0, %p195_p1 }
   0x5   : > { %s475_s20 = sshll.u32 (!%p196_p2), %s470_s19, 1  ;;  %v258_v0 = vlaneseq (!%p196_p2)  ;;  %v518_v11 = vmov (!%p196_p2), 0.0   ;;  %p484_p4 = scmp.ne.s32.totalorder (!%p196_p2), %s470_s19, 0 }
   0x6   : > { %199 = sbr.rel (%p196_p2) target bundleno = 227 (0xe3), region = 28  ;;  %p233_p3 = scmp.lt.s32.totalorder (!%p196_p2), %s475_s20, 7 }
   0x7   : > { %v561_v1 = vshrl.u32 (!%p196_p2), %v258_v0, 7 }
   0x9   : > { %v262_v2 = vsub.s32 (!%p196_p2), 0, %v561_v1  ;;  %v266_v3 = vsub.s32 (!%p196_p2), 1, %v561_v1 }
   0xd   : > { %s644_s20 = smov (!%p233_p3, %s475_s20), 7  ;;  %vm319_vm3 = vcmask (!%p484_p4), 7168   ;;  %v519_v52 = vmov (!%p484_p4), 0.0  }
   0xe   : > { %s476_s21 = sshll.u32 %s644_s20, 3  ;;  %s241_s24 = scalar_lea.vmem %s638_s1, %s644_s20  ;;  %320 = vst.msk [vmem:[%s641_s4] sm:$0xff] (!%p484_p4), %vm319_vm3, %v519_v52  ;;  %321 = vst.msk [vmem:[%s642_s5] sm:$0xff] (!%p484_p4), %vm319_vm3, %v519_v52 }
   0xf   : > { %s236_s27 = scalar_lea.vmem %s637_s0, %s476_s21  ;;  %s574_s30 = scalar_lea.vmem %s639_s2, %s476_s21  ;;  %v576_v4 = vld [vmem:[%s241_s24] sm:$0x3] }
  0x10   : > { %s581_s8 = scalar_lea.vmem %s640_s3, %s476_s21  ;;  %v255_v5 = vld [vmem:[%s236_s27] sm:$0xff]  ;;  %v256_v6 = vld [vmem:[%s236_s27 + $0x8] sm:$0xff]  ;;  %v263_v7 = vrot.slane %v576_v4, %v262_v2  ;;  %v267_v8 = vrot.slane %v576_v4, %v266_v3  ;;  %vm274_vm0 = vcmp.ge.s32.totalorder %v576_v4, 0 }
  0x11   : > { %v275_v9 = vrot.slane %v255_v5, 4  ;;  %v281_v10 = vrot.slane %v256_v6, 4 }
  0x12   : > { %vm268_vm1 = vcmp.eq.s32.totalorder %v263_v7, %v561_v1  ;;  %vm269_vm2 = vcmp.eq.s32.totalorder %v267_v8, %v561_v1 }
  0x13   : > { %v592_v12 = vsel %vm268_vm1, 1.0, %v518_v11  ;;  %v594_v13 = vsel %vm269_vm2, 1.0, %v518_v11  ;;  %v276_v14 = vmax.f32 %v255_v5, %v275_v9  ;;  %v282_v15 = vmax.f32 %v256_v6, %v281_v10 }
  0x15   : > { %v277_v16 = vrot.slane %v276_v14, 2  ;;  %v283_v17 = vrot.slane %v282_v15, 2 }
  0x17   : > { %v278_v18 = vmax.f32 %v276_v14, %v277_v16  ;;  %v284_v19 = vmax.f32 %v282_v15, %v283_v17 }
  0x19   : > { %v279_v20 = vrot.slane %v278_v18, 1  ;;  %v285_v21 = vrot.slane %v284_v19, 1 }
  0x1b   : > { %v280_v22 = vmax.f32 %v278_v18, %v279_v20  ;;  %v286_v23 = vmax.f32 %v284_v19, %v285_v21 }
  0x1d   : > { %v287_v24 = vsub.f32 %v255_v5, %v280_v22  ;;  %v288_v25 = vsub.f32 %v256_v6, %v286_v23 }
  0x1f   : > { %v289_v26 = vmul.f32 1.442695, %v287_v24  ;;  %v291_v27 = vmul.f32 1.442695, %v288_v25 }
  0x21   : > { %498 = vpow2.f32 %v289_v26 }
  0x22   : > { %500 = vpow2.f32 %v291_v27 }
  0x2b   : > { %v499_v28 = vpop.eup %498 }
  0x2c   : > { %v501_v29 = vpop.eup %500  ;;  %v293_v30 = vrot.slane %v499_v28, 4 }
  0x2d   : > { %v299_v31 = vrot.slane %v501_v29, 4 }
  0x2e   : > { %v294_v32 = vadd.f32 %v499_v28, %v293_v30 }
  0x2f   : > { %v300_v33 = vadd.f32 %v501_v29, %v299_v31 }
  0x30   : > { %v295_v34 = vrot.slane %v294_v32, 2 }
  0x31   : > { %v301_v35 = vrot.slane %v300_v33, 2 }
  0x32   : > { %v296_v36 = vadd.f32 %v295_v34, %v294_v32 }
  0x33   : > { %v302_v37 = vadd.f32 %v301_v35, %v300_v33 }
  0x34   : > { %v297_v38 = vrot.slane %v296_v36, 1 }
  0x35   : > { %v303_v39 = vrot.slane %v302_v37, 1 }
  0x36   : > { %v298_v40 = vadd.f32 %v297_v38, %v296_v36 }
  0x37   : > { %v304_v41 = vadd.f32 %v303_v39, %v302_v37 }
  0x38   : > { %502 = vrcp.f32 %v298_v40 }
  0x39   : > { %504 = vrcp.f32 %v304_v41 }
  0x3a   : > { %506 = vlog2.f32 %v298_v40 }
  0x3b   : > { %508 = vlog2.f32 %v304_v41 }
  0x42   : > { %v503_v42 = vpop.eup %502  ;;  %318 = sbr.rel (%p484_p4) target bundleno = 73 (0x49), region = 32 }
  0x43   : > { %v505_v43 = vpop.eup %504  ;;  %v306_v44 = vmul.f32 %v503_v42, %v499_v28 }
  0x44   : > { %v507_v45 = vpop.eup %506  ;;  %v308_v46 = vmul.f32 %v505_v43, %v501_v29 }
  0x45   : > { %v509_v47 = vpop.eup %508  ;;  %v310_v48 = vmul.f32 0.6931472, %v507_v45 }
  0x46   : > { %v312_v49 = vmul.f32 0.6931472, %v509_v47 }
  0x47   : > { %v313_v50 = vsub.f32 %v287_v24, %v310_v48 }
  0x48   : > { %v314_v51 = vsub.f32 %v288_v25, %v312_v49 }
  0x49 PF: > { %v330_v53 = vmul.f32 %v592_v12, %v313_v50  ;;  %357 = vst [vmem:[%s581_s8] sm:$0xff] %v592_v12  ;;  %358 = vst [vmem:[%s581_s8 + $0x8] sm:$0xff] %v594_v13  ;;  %v323_v56 = vadd.f32 %v594_v13, %v592_v12  ;;  %v338_v57 = vsub.f32 %v592_v12, %v306_v44  ;;  %v520_v58 = vmov 0   ;;  %v329_v4 = vld [vmem:[%s642_s5] sm:$0xff] }
  0x4a   : > { %v331_v54 = vmul.f32 %v594_v13, %v314_v51  ;;  %v342_v59 = vsel %vm274_vm0, 1, %v520_v58  ;;  %v339_v60 = vsub.f32 %v594_v13, %v308_v46  ;;  %vm327_vm6 = vcmask 7168  }
  0x4b   : > { %v346_v61 = vrot.slane %v342_v59, %v262_v2  ;;  %v340_v62 = vand.u32 2147483647, %v338_v57  ;;  %v350_v63 = vrot.slane %v342_v59, %v266_v3  ;;  %v322_v2 = vld [vmem:[%s641_s4] sm:$0xff] }
  0x4c   : > { %v332_v55 = vadd.f32 %v331_v54, %v330_v53  ;;  %v341_v0 = vand.u32 2147483647, %v339_v60 }
  0x4d   : > { %vm351_vm4 = vcmp.eq.s32.totalorder %v346_v61, 1  ;;  %vm352_vm5 = vcmp.eq.s32.totalorder %v350_v63, 1 }
  0x4e   : > { %333 = vadd.xlane.f32.xlu0 %v332_v55  ;;  %v353_v5 = vsel %vm351_vm4, %v340_v62, 0.0  ;;  %v354_v6 = vsel %vm352_vm5, %v341_v0, 0.0 }
  0x4f   : > { %355 = vst [vmem:[%s574_s30] sm:$0xff] %v353_v5  ;;  %356 = vst [vmem:[%s574_s30 + $0x8] sm:$0xff] %v354_v6 }
  0x52   : > { %324 = vadd.xlane.f32.xlu0 %v323_v56 }
  0xdb   : > { %v334_v7 = vpop.xlane.xlu0 %333 }
  0xdc   : > { %v335_v8 = vsub.f32 0.0, %v334_v7 }
  0xde   : > { %v336_v1 = vadd.f32 %v335_v8, %v329_v4 }
  0xdf   : > { %v325_v3 = vpop.xlane.xlu0 %324 }
  0xe0   : > { %337 = vst.msk [vmem:[%s642_s5] sm:$0xff] %vm327_vm6, %v336_v1  ;;  %v326_v9 = vadd.f32 %v325_v3, %v322_v2 }
  0xe2   : > { %328 = vst.msk [vmem:[%s641_s4] sm:$0xff] %vm327_vm6, %v326_v9 }
  0xe3 PF: > { %s16_s18 = sadd.s32 1, %s516_s18  }
  0xe4   : > { %p13_p5 = scmp.ge.s32.totalorder %s16_s18, 6  }
  0xe6   :  { %15 = sbr.rel (!%p13_p5) target bundleno = 1 (0x1), region = 93 }

// kernel: cpgnet_criterion.3
= control target key start
LH: loop header
LB: loop body
LE: loop exit
PB: predicated region body
PF: predicated region fallthrough
CT: control target
= control target key end

     0   :  { %9 = vsyncpa [#allocation6], 0  ;;  %s656_s15 = smov 0   ;;  %s747_s0 = inlined_call_operand.vmem [shape: f32[8,1024], index: 0, kind: input, shape index: {}]   ;;  %s748_s1 = inlined_call_operand.vmem [shape: f32[8,1024], index: 1, kind: input, shape index: {}]   ;;  %s749_s2 = inlined_call_operand.vmem [shape: f32[8,1], index: 2, kind: input, shape index: {}]   ;;  %s750_s3 = inlined_call_operand.vmem [shape: f32[8,1], index: 3, kind: input, shape index: {}]   ;;  %s751_s4 = inlined_call_operand.vmem [shape: f32[4], index: 4, kind: output, shape index: {}]  }
   0x1 LB: > { %s662_s16 = sadd.s32 4294967295, %s617_s15   ;;  %p530_p0 = scmp.ge.s32.totalorder %s617_s15, 1  ;;  %s617_s15 = sphi %s656_s15, %s15_s15  }
   0x2   : > { %p170_p1 = scmp.lt.s32.totalorder %s617_s15, 5 }
   0x4   : > { %p171_p2 = pnand %p530_p0, %p170_p1 }
   0x5   : > { %s531_s17 = sshll.u32 (!%p171_p2), %s662_s16, 1  ;;  %p535_p4 = scmp.ne.s32.totalorder (!%p171_p2), %s662_s16, 0 }
   0x6   : > { %174 = sbr.rel (%p171_p2) target bundleno = 1523 (0x5f3), region = 36  ;;  %p197_p3 = scmp.lt.s32.totalorder (!%p171_p2), %s531_s17, 7 }
   0xd   : > { %s753_s17 = smov (!%p197_p3, %s531_s17), 7  ;;  %211 = sbr.rel (%p535_p4) target bundleno = 20 (0x14), region = 40 }
   0xe   : > { %s532_s18 = sshll.u32 %s753_s17, 3  ;;  %vm212_vm0 = vcmask (!%p535_p4), 7168   ;;  %v619_v0 = vmov (!%p535_p4), 0.0  }
   0xf   : > { %s670_s21 = scalar_lea.vmem %s747_s0, %s532_s18  ;;  %s206_s24 = scalar_lea.vmem %s748_s1, %s532_s18  ;;  %213 = vst.msk [vmem:[#allocation2] sm:$0xff] (!%p535_p4), %vm212_vm0, %v619_v0  ;;  %214 = vst.msk [vmem:[#allocation3] sm:$0xff] (!%p535_p4), %vm212_vm0, %v619_v0 }
  0x10   : > { %215 = vst.msk [vmem:[#allocation4] sm:$0xff] (!%p535_p4), %vm212_vm0, %v619_v0 }
  0x14 PF: > { %v216_v1 = vld [vmem:[%s206_s24] sm:$0xff]  ;;  %s620_s25 = smov 1   ;;  %v217_v2 = vld [vmem:[%s206_s24 + $0x8] sm:$0xff]  ;;  %v223_v3 = vlaneseq  ;;  %s621_s26 = smov 2   ;;  %v624_v26 = vmov 0   ;;  %vm381_vm0 = vcmask 7168  }
  0x15   : > { %228 = vrot.lane.b32.xlu0 %v216_v1, %s620_s25  ;;  %s622_s27 = smov 4   ;;  %s623_s28 = smov 8   ;;  %582 = vset.pattern.permute.xlu1 %v624_v26  ;;  %v697_v42 = vld [vmem:[%s749_s2] sm:$0xff] }
  0x16   : > { %v678_v4 = vand.u32 127, %v223_v3  ;;  %581 = vset.pattern.permute.xlu0 %v624_v26  ;;  %s625_s29 = smov 16   ;;  %s626_s30 = smov 32   ;;  %v323_v41 = vld [vmem:[#allocation2] sm:$0xff]  ;;  %v358_v50 = vld [vmem:[#allocation3] sm:$0xff] }
  0x17   : > { %s627_s7 = smov 64   ;;  %s536_s8 = sshll.u32 %s662_s16, 8 }
  0x18   : > { %vm232_vm1 = vcmp.lt.s32.totalorder %v678_v4, 1  ;;  %vm226_vm2 = vcmp.ge.s32.totalorder %v678_v4, 1  ;;  %vm245_vm3 = vcmp.lt.s32.totalorder %v678_v4, 2  ;;  %vm239_vm4 = vcmp.ge.s32.totalorder %v678_v4, 2  ;;  %p537_p5 = scmp.ne.s32.totalorder %s662_s16, 3 }
  0x19   : > { %230 = vrot.lane.b32.xlu0 %v217_v2, %s620_s25  ;;  %vm258_vm5 = vcmp.lt.s32.totalorder %v678_v4, 4  ;;  %vm252_vm6 = vcmp.ge.s32.totalorder %v678_v4, 4  ;;  %vm271_vm7 = vcmp.lt.s32.totalorder %v678_v4, 8  ;;  %vm265_vm8 = vcmp.ge.s32.totalorder %v678_v4, 8  ;;  %s629_s13 = smov (!%p537_p5), 0.0  }
  0x1a   : > { %vm284_vm9 = vcmp.lt.s32.totalorder %v678_v4, 16  ;;  %vm278_vm10 = vcmp.ge.s32.totalorder %v678_v4, 16  ;;  %vm297_vm11 = vcmp.lt.s32.totalorder %v678_v4, 32  ;;  %vm291_vm12 = vcmp.ge.s32.totalorder %v678_v4, 32  ;;  %463 = sst [smem:[#allocation5 + $0x2]] (!%p537_p5), %s629_s13 }
  0x1b   : > { %v332_v51 = vstv %s536_s8  ;;  %v225_v52 = vadd.s32 128, %v678_v4  ;;  %vm310_vm13 = vcmp.lt.s32.totalorder %v678_v4, 64  ;;  %vm304_vm14 = vcmp.ge.s32.totalorder %v678_v4, 64 }
  0x1c   : > { %v333_v53 = vadd.s32 %v332_v51, %v678_v4  ;;  %vm356_vm15 = vcmp.eq.s32.totalorder %v678_v4, 0 }
  0x1d   : > { %v334_v55 = vadd.s32 %v332_v51, %v225_v52 }
  0x1e   : > { %v335_v56 = vadd.s32 1, %v333_v53 }
  0x1f   : > { %v336_v60 = vadd.s32 1, %v334_v55 }
  0x20   : > { %v337_v0 = vcvt.s32.f32 %v335_v56 }
  0x87   : > { %v229_v5 = vpop.permute.xlu0 %228 }
  0x8b   : > { %v231_v6 = vpop.permute.xlu0 %230 }
  0x8c   : > { %v234_v7 = vsel %vm232_vm1, %v231_v6, %v229_v5  ;;  %v233_v10 = vsel %vm232_vm1, %v229_v5, %v231_v6 }
  0x8d   : > { %v235_v8 = vsel %vm226_vm2, %v234_v7, 0.0  ;;  %v238_v11 = vadd.f32 %v233_v10, %v217_v2  ;;  %v338_v2 = vcvt.s32.f32 %v336_v60 }
  0x8e   : > { %v237_v9 = vadd.f32 %v235_v8, %v216_v1 }
  0x90   : > { %241 = vrot.lane.b32.xlu1 %v237_v9, %s621_s26 }
  0x94   : > { %243 = vrot.lane.b32.xlu1 %v238_v11, %s621_s26 }
 0x102   : > { %v242_v12 = vpop.permute.xlu1 %241 }
 0x106   : > { %v244_v13 = vpop.permute.xlu1 %243 }
 0x107   : > { %v246_v14 = vsel %vm245_vm3, %v242_v12, %v244_v13  ;;  %v247_v15 = vsel %vm245_vm3, %v244_v13, %v242_v12 }
 0x108   : > { %v248_v16 = vsel %vm239_vm4, %v247_v15, 0.0  ;;  %v251_v17 = vadd.f32 %v246_v14, %v238_v11 }
 0x109   : > { %v250_v18 = vadd.f32 %v248_v16, %v237_v9 }
 0x10a   : > { %256 = vrot.lane.b32.xlu1 %v251_v17, %s622_s27 }
 0x10b   : > { %254 = vrot.lane.b32.xlu0 %v250_v18, %s622_s27 }
 0x17c   : > { %v257_v19 = vpop.permute.xlu1 %256 }
 0x17d   : > { %v255_v20 = vpop.permute.xlu0 %254 }
 0x17e   : > { %v259_v21 = vsel %vm258_vm5, %v255_v20, %v257_v19  ;;  %v260_v22 = vsel %vm258_vm5, %v257_v19, %v255_v20 }
 0x17f   : > { %v261_v23 = vsel %vm252_vm6, %v260_v22, 0.0  ;;  %v264_v24 = vadd.f32 %v259_v21, %v251_v17  ;;  %v219_v21 = vld [vmem:[%s670_s21 + $0x8] sm:$0xff]  ;;  %v218_v22 = vld [vmem:[%s670_s21] sm:$0xff] }
 0x180   : > { %v263_v25 = vadd.f32 %v261_v23, %v250_v18 }
 0x181   : > { %269 = vrot.lane.b32.xlu1 %v264_v24, %s623_s28 }
 0x182   : > { %267 = vrot.lane.b32.xlu0 %v263_v25, %s623_s28 }
 0x1f3   : > { %v270_v27 = vpop.permute.xlu1 %269 }
 0x1f4   : > { %v268_v28 = vpop.permute.xlu0 %267 }
 0x1f5   : > { %v272_v29 = vsel %vm271_vm7, %v268_v28, %v270_v27  ;;  %v273_v30 = vsel %vm271_vm7, %v270_v27, %v268_v28  ;;  %v220_v28 = vsub.f32 0.0, %v218_v22 }
 0x1f6   : > { %v274_v31 = vsel %vm265_vm8, %v273_v30, 0.0  ;;  %v277_v32 = vadd.f32 %v272_v29, %v264_v24 }
 0x1f7   : > { %v276_v33 = vadd.f32 %v274_v31, %v263_v25  ;;  %v221_v25 = vsub.f32 0.0, %v219_v21 }
 0x1f8   : > { %282 = vrot.lane.b32.xlu1 %v277_v32, %s625_s29 }
 0x1f9   : > { %280 = vrot.lane.b32.xlu0 %v276_v33, %s625_s29 }
 0x26a   : > { %v283_v34 = vpop.permute.xlu1 %282 }
 0x26b   : > { %v281_v35 = vpop.permute.xlu0 %280 }
 0x26c   : > { %v285_v36 = vsel %vm284_vm9, %v281_v35, %v283_v34  ;;  %v286_v37 = vsel %vm284_vm9, %v283_v34, %v281_v35 }
 0x26d   : > { %v287_v38 = vsel %vm278_vm10, %v286_v37, 0.0  ;;  %v290_v39 = vadd.f32 %v285_v36, %v277_v32  ;;  %v374_v37 = vld [vmem:[#allocation4] sm:$0xff] }
 0x26e   : > { %v289_v40 = vadd.f32 %v287_v38, %v276_v33 }
 0x26f   : > { %295 = vrot.lane.b32.xlu1 %v290_v39, %s626_s30 }
 0x270   : > { %293 = vrot.lane.b32.xlu0 %v289_v40, %s626_s30 }
 0x274   : > { %326 = vperm.xlu0 %581, %v323_v41   ;;  %v628_v41 = vmov (!%p537_p5), 0.0  }
 0x278   : > { %343 = vperm.xlu0 %581, %v697_v42  }
 0x2e1   : > { %v296_v43 = vpop.permute.xlu1 %295 }
 0x2e2   : > { %v294_v44 = vpop.permute.xlu0 %293 }
 0x2e3   : > { %v299_v45 = vsel %vm297_vm11, %v296_v43, %v294_v44  ;;  %v298_v48 = vsel %vm297_vm11, %v294_v44, %v296_v43 }
 0x2e4   : > { %v300_v46 = vsel %vm291_vm12, %v299_v45, 0.0  ;;  %v303_v49 = vadd.f32 %v298_v48, %v290_v39  ;;  %v431_v48 = vld [vmem:[%s750_s3] sm:$0xff] (!%p537_p5) }
 0x2e5   : > { %v302_v47 = vadd.f32 %v300_v46, %v289_v40  ;;  %v427_v40 = vmul.f32 (!%p537_p5), 0.001, %v697_v42 }
 0x2e7   : > { %306 = vrot.lane.b32.xlu1 %v302_v47, %s627_s7  ;;  %v428_v45 = vadd.f32 (!%p537_p5), 0.001, %v427_v40 }
 0x2eb   : > { %308 = vrot.lane.b32.xlu1 %v303_v49, %s627_s7 }
 0x2ef   : > { %367 = vperm.xlu1 %582, %v358_v50  }
 0x2f3   : > { %v327_v63 = vpop.permute.xlu0 %326 }
 0x2f7   : > { %v344_v8 = vpop.permute.xlu0 %343 }
 0x359   : > { %v307_v54 = vpop.permute.xlu1 %306 }
 0x35d   : > { %v309_v57 = vpop.permute.xlu1 %308 }
 0x35e   : > { %v311_v58 = vsel %vm310_vm13, %v307_v54, %v309_v57  ;;  %v312_v59 = vsel %vm310_vm13, %v309_v57, %v307_v54 }
 0x35f   : > { %v313_v61 = vsel %vm304_vm14, %v312_v59, 0.0  ;;  %v316_v62 = vadd.f32 %v311_v58, %v303_v49 }
 0x360   : > { %v315_v1 = vadd.f32 %v313_v61, %v302_v47 }
 0x362   : > { %v322_v3 = vadd.f32 %v316_v62, %v315_v1  ;;  %v329_v5 = vadd.f32 %v327_v63, %v315_v1 }
 0x364   : > { %v330_v6 = vadd.f32 %v327_v63, %v322_v3  ;;  %v339_v7 = vsub.f32 %v337_v0, %v329_v5  ;;  %v346_v12 = vsub.f32 %v344_v8, %v329_v5 }
 0x366   : > { %v340_v9 = vsub.f32 %v338_v2, %v330_v6  ;;  %v348_v10 = vadd.f32 %v344_v8, %v339_v7  ;;  %v347_v14 = vsub.f32 %v344_v8, %v330_v6 }
 0x368   : > { %v349_v11 = vadd.f32 %v344_v8, %v340_v9  ;;  %583 = vrcp.f32 %v348_v10 }
 0x36a   : > { %585 = vrcp.f32 %v349_v11 }
 0x36b   : > { %587 = vrcp.f32 (!%p537_p5), %v428_v45 }
 0x36e   : > { %v368_v20 = vpop.permute.xlu1 %367 }
 0x372   : > { %v584_v13 = vpop.eup %583 }
 0x373   : > { %v351_v15 = vmul.f32 %v584_v13, %v346_v12 }
 0x374   : > { %v586_v16 = vpop.eup %585 }
 0x375   : > { %v354_v17 = vsub.f32 1.0, %v351_v15  ;;  %v353_v18 = vmul.f32 %v586_v16, %v347_v14  ;;  %v588_v49 = vpop.eup (!%p537_p5), %587 }
 0x376   : > { %v432_v50 = vmul.f32 (!%p537_p5), %v588_v49, %v431_v48  ;;  %v443_v51 = vmul.f32 (!%p537_p5), %v588_v49, %v697_v42 }
 0x377   : > { %359 = vrot.lane.b32.xlu0 %v354_v17, %s620_s25  ;;  %v355_v19 = vsub.f32 1.0, %v353_v18 }
 0x378   : > { %v433_v52 = vsel (!%p537_p5), %vm381_vm0, %v432_v50, 0.0  ;;  %v444_v53 = vsel (!%p537_p5), %vm381_vm0, %v443_v51, 0.0 }
 0x379   : > { %361 = vrot.lane.b32.xlu1 %v355_v19, %s620_s25 }
 0x37d   : > { %384 = vrot.lane.b32.xlu1 %v330_v6, %s620_s25 }
 0x381   : > { %389 = vrot.lane.b32.xlu1 %v355_v19, %s620_s25 }
 0x3a5   : > { %434 = vadd.xlane.f32.xlu1 (!%p537_p5), %v433_v52 }
 0x3a9   : > { %445 = vadd.xlane.f32.xlu1 (!%p537_p5), %v444_v53 }
 0x3e9   : > { %v360_v23 = vpop.permute.xlu0 %359 }
 0x3eb   : > { %v362_v24 = vpop.permute.xlu1 %361 }
 0x3ec   : > { %v363_v26 = vsel %vm232_vm1, %v360_v23, %v362_v24  ;;  %v364_v27 = vsel %vm232_vm1, %v362_v24, %v360_v23  ;;  %vm397_vm1 = vcmp.gt.f32.partialorder (!%p537_p5), %v697_v42, 0.0 }
 0x3ed   : > { %v370_v29 = vsel %vm356_vm15, %v368_v20, %v364_v27  ;;  %v373_v30 = vsub.f32 %v355_v19, %v363_v26  ;;  %v538_v43 = vsel (!%p537_p5), %vm397_vm1, 1.0, %v628_v41 }
 0x3ee   : > { %v372_v31 = vsub.f32 %v354_v17, %v370_v29  ;;  %v412_v47 = vsel (!%p537_p5), %vm381_vm0, %v538_v43, 0.0 }
 0x3ef   : > { %v385_v32 = vpop.permute.xlu1 %384  ;;  %v376_v33 = vmul.f32 %v373_v30, %v221_v25 }
 0x3f0   : > { %387 = vst.msk [vmem:[#allocation2] sm:$0xff] %vm381_vm0, %v385_v32  ;;  %v375_v34 = vmul.f32 %v372_v31, %v220_v28 }
 0x3f2   : > { %v377_v35 = vadd.f32 %v376_v33, %v375_v34 }
 0x3f3   : > { %v390_v36 = vpop.permute.xlu1 %389 }
 0x3f4   : > { %392 = vst.msk [vmem:[#allocation3] sm:$0xff] %vm381_vm0, %v390_v36  ;;  %378 = vadd.xlane.f32.xlu0 %v377_v35 }
 0x432   : > { %v435_v3 = vpop.xlane.xlu1 (!%p537_p5), %434 }
 0x433   : > { %v436_v6 = vrot.slane (!%p537_p5), %v435_v3, 4 }
 0x435   : > { %v437_v8 = vadd.f32 (!%p537_p5), %v436_v6, %v435_v3 }
 0x436   : > { %v446_v5 = vpop.xlane.xlu1 (!%p537_p5), %445 }
 0x437   : > { %v447_v7 = vrot.slane (!%p537_p5), %v446_v5, 4  ;;  %v438_v10 = vrot.slane (!%p537_p5), %v437_v8, 2 }
 0x439   : > { %v448_v9 = vadd.f32 (!%p537_p5), %v447_v7, %v446_v5  ;;  %v439_v13 = vadd.f32 (!%p537_p5), %v438_v10, %v437_v8 }
 0x43b   : > { %v449_v11 = vrot.slane (!%p537_p5), %v448_v9, 2  ;;  %v440_v15 = vrot.slane (!%p537_p5), %v439_v13, 1 }
 0x43d   : > { %v450_v14 = vadd.f32 (!%p537_p5), %v449_v11, %v448_v9  ;;  %v441_v18 = vadd.f32 (!%p537_p5), %v440_v15, %v439_v13 }
 0x43f   : > { %v451_v16 = vrot.slane (!%p537_p5), %v450_v14, 1 }
 0x441   : > { %v452_v19 = vadd.f32 (!%p537_p5), %v451_v16, %v450_v14 }
 0x47e   : > { %396 = sbr.rel (%p537_p5) target bundleno = 1507 (0x5e3), region = 44 }
 0x481   : > { %v379_v38 = vpop.xlane.xlu0 %378 }
 0x482   : > { %v380_v39 = vadd.f32 %v379_v38, %v374_v37 }
 0x484   : > { %382 = vst.msk [vmem:[#allocation4] sm:$0xff] %vm381_vm0, %v380_v39 }
 0x48b   : > { %v400_v4 = vld [vmem:[#allocation4] sm:$0xff] }
 0x48c   : > { %v401_v44 = vmul.f32 %v538_v43, %v400_v4 }
 0x48e   : > { %v402_v46 = vsel %vm381_vm0, %v401_v44, 0.0 }
 0x48f   : > { %403 = vadd.xlane.f32.xlu0 %v402_v46 }
 0x493   : > { %413 = vadd.xlane.f32.xlu0 %v412_v47 }
 0x51c   : > { %v404_v54 = vpop.xlane.xlu0 %403 }
 0x51d   : > { %v405_v55 = vrot.slane %v404_v54, 4 }
 0x51f   : > { %v406_v56 = vadd.f32 %v405_v55, %v404_v54 }
 0x520   : > { %v414_v57 = vpop.xlane.xlu0 %413 }
 0x521   : > { %v407_v58 = vrot.slane %v406_v56, 2  ;;  %v415_v59 = vrot.slane %v414_v57, 4 }
 0x523   : > { %v416_v60 = vadd.f32 %v415_v59, %v414_v57  ;;  %v408_v61 = vadd.f32 %v407_v58, %v406_v56 }
 0x525   : > { %v417_v62 = vrot.slane %v416_v60, 2  ;;  %v409_v63 = vrot.slane %v408_v61, 1 }
 0x527   : > { %v418_v0 = vadd.f32 %v417_v62, %v416_v60  ;;  %v410_v1 = vadd.f32 %v409_v63, %v408_v61 }
 0x529   : > { %543 = vpush %v410_v1  ;;  %v419_v42 = vrot.slane %v418_v0, 1 }
 0x52b   : > { %v420_v2 = vadd.f32 %v419_v42, %v418_v0 }
 0x52d   : > { %545 = vpush %v420_v2 }
 0x55a   : > { %s544_s11 = spop %543 }
 0x55e   : > { %s546_s12 = spop %545 }
 0x55f   : > { %v422_v12 = vstv %s546_s12 }
 0x560   : > { %589 = vrcp.f32 %v422_v12 }
 0x56a   : > { %v590_v17 = vpop.eup %589 }
 0x56b   : > { %547 = vpush %v590_v17 }
 0x56c   : > { %549 = vpush %v441_v18 }
 0x56d   : > { %551 = vpush %v452_v19 }
 0x59c   : > { %s548_s14 = spop %547 }
 0x59d   : > { %s425_s17 = smul.f32 %s548_s14, %s544_s11  ;;  %s550_s18 = spop %549 }
 0x59e   : > { %s552_s19 = spop %551 }
 0x59f   : > { %461 = sst [smem:[#allocation5 + $0x1]] %s425_s17  ;;  %v454_v20 = vstv %s552_s19  ;;  %s464_s22 = smul.f32 2.0, %s425_s17 }
 0x5a0   : > { %591 = vrcp.f32 %v454_v20 }
 0x5aa   : > { %v592_v21 = vpop.eup %591 }
 0x5ab   : > { %553 = vpush %v592_v21 }
 0x5dc   : > { %s554_s20 = spop %553 }
 0x5dd   : > { %s457_s21 = smul.f32 %s554_s20, %s550_s18 }
 0x5df   : > { %459 = sst [smem:[#allocation5]] %s457_s21 }
 0x5e0   : > { %s465_s23 = sadd.f32 %s464_s22, %s457_s21 }
 0x5e2   : > { %467 = sst [smem:[#allocation5 + $0x3]] %s465_s23 }
 0x5e3 PF: > { %p559_p6 = scmp.eq.s32.totalorder %s662_s16, 3  ;;  %s475_s26 = sshll.u32 %s751_s4, 4  ;;  %s476_s26 = int_to_ptr.vmem [resolvable:$true] %s475_s26 }
 0x5e4   : > { %s593_s27 = scalar_lea.vmem %s476_s26, 16  ;;  %p600_p10 = scmp.lt.s32.totalorder %s476_s26, %s476_s26 }
 0x5e5   : > { %p594_p7 = scmp.ne.s32.totalorder %s476_s26, %s593_s27  ;;  %p601_p11 = scmp.lt.s32.totalorder %s593_s27, %s593_s27 }
 0x5e7   : > { %p595_p8 = pnand %p594_p7, %p559_p6  ;;  %p602_p12 = por %p601_p11, %p600_p10 }
 0x5e9   : > { %p596_p9 = pneg %p595_p8 }
 0x5eb   : > { %p603_p13 = pnand %p602_p12, %p596_p9 }
 0x5ed   : > { %606 = shalt.err (!%p603_p13)
}
 0x5ee   : > { %s630_s28 = smov [#allocation5]  }
 0x5ef   : > { %556 = dma.smem_to_vmem (%p559_p6), %s630_s28, 16, %s476_s26, [#allocation6]  }
 0x5f0   : > { %612 = dma.done.wait (%p559_p6), [#allocation6], 16  }
 0x5f1   : > { %614 = vsyncadd (%p559_p6), [#allocation6], 4294967280 }
 0x5f2   : > { %483 = sfence }
 0x5f3 PF: > { %s15_s15 = sadd.s32 1, %s617_s15  }
 0x5f4   : > { %p12_p0 = scmp.ge.s32.totalorder %s15_s15, 6  }
 0x5f6   :  { %14 = sbr.rel (!%p12_p0) target bundleno = 1 (0x1), region = 78 }
 0x5fd   :  { %489 = vsyncpa [#allocation6], 1 }
 0x5fe   :  { %491 = vsyncpa [#allocation6 + $0x1], 1 }

</bundles_post_ra>
